<compile_context>
chip_gen: v5e
topology: v5e:2x2
jax: 0.10.0
libtpu: 0.0.40
codegen_flags: <defaults>
</compile_context>

<pallas_src>
import jax
import jax.numpy as jnp
from jax.experimental import pallas as pl
from jax.experimental.pallas import tpu as pltpu


def _round_up(n, m):
    return ((n + m - 1) // m) * m


# Max batch-tile (lanes).  (tile_b, 13) f32 blocks are lane-padded to 128 in
# VMEM -> 512 B/row -> 16 MiB double-buffered at 16384; keeps total scoped
# VMEM well under v7x's 64 MiB (v5e/v6e have 128 MiB of headroom).
_MAX_TILE_B = 16384
# Aim for this many grid steps so v7x's two TensorCores each get several tiles.
_TARGET_GRID_STEPS = 8


def _pick_tile_b(n):
    per_step = -(-n // _TARGET_GRID_STEPS)          # ceil(n / target_steps)
    tile = _round_up(max(per_step, 1), 128)
    return max(128, min(_MAX_TILE_B, tile))


def _sigmoid(z):
    # One EUP transcendental (tanh) + VPU mul/add; no true divide.
    return 0.5 * jnp.tanh(0.5 * z) + 0.5


def mlp_kernel(x_ref, w1_ref, b1_ref, w2_ref, b2_ref, w3_ref, b3_ref, o_ref):
    """x_ref: (tile_b, 13) block of the original input; o_ref: (1, tile_b)."""
    x = x_ref[...]
    if x.dtype != jnp.float32:
        # bf16 producers: upcast in VMEM (v5e VPU/EUP have no bf16); the DMA
        # saving from streaming bf16 over HBM still applies.
        x = x.astype(jnp.float32)

    # Layer 1: contract x's LAST axis (features) so the batch lands on lanes
    # without any wrapper-side transpose.  (6,13) x (tile_b,13) -> (6,tile_b).
    h1 = jax.lax.dot_general(
        w1_ref[...], x,
        dimension_numbers=(((1,), (1,)), ((), ())),
        preferred_element_type=jnp.float32,
    )
    h1 = _sigmoid(h1 + b1_ref[...])                                     # (6, tile_b)

    h2 = jnp.dot(w2_ref[...], h1, preferred_element_type=jnp.float32)   # (3, tile_b)
    h2 = _sigmoid(h2 + b2_ref[...])

    y = jnp.dot(w3_ref[...], h2, preferred_element_type=jnp.float32)    # (1, tile_b)
    o_ref[...] = (y + b3_ref[...]).astype(o_ref.dtype)                  # lane-dense store


def network_forward(x, params, *, tile_b=None):
    """x: (N, 13). params: PyTorch-layout w1,b1,w2,b2,w3,b3. Returns (N, 1)."""
    n, f = x.shape
    assert f == 13

    if tile_b is None:
        tile_b = _pick_tile_b(n)
    assert tile_b % 128 == 0, "tile_b must be a multiple of 128 (lane width)"

    # Ragged final tile instead of jnp.pad: Pallas masks the OOB writeback.
    grid = (pl.cdiv(n, tile_b),)

    w1, b1, w2, b2, w3, b3 = (params[k] for k in ("w1", "b1", "w2", "b2", "w3", "b3"))

    def resident(shape):
        # Full-shape block + constant index_map: DMA'd once, stays VMEM-resident.
        return pl.BlockSpec(shape, lambda i: (0, 0))

    out = pl.pallas_call(
        mlp_kernel,
        out_shape=jax.ShapeDtypeStruct((1, n), x.dtype),
        grid=grid,
        in_specs=[
            pl.BlockSpec((tile_b, 13), lambda i: (i, 0)),   # original-layout x tiles
            resident((6, 13)), resident((6, 1)),            # layer 1
            resident((3, 6)), resident((3, 1)),             # layer 2
            resident((1, 3)), resident((1, 1)),             # layer 3
        ],
        out_specs=pl.BlockSpec((1, tile_b), lambda i: (0, i)),  # lane-dense output
        compiler_params=pltpu.CompilerParams(
            dimension_semantics=("parallel",),      # batch tiles shard over TCs (v7x)
            vmem_limit_bytes=48 * 1024 * 1024,      # <= ~30 MiB used; safe on v7x (64 MiB)
        ),
    )(x, w1, b1, w2, b2, w3, b3)

    # (1, N) -> (N, 1); output traffic is tiny relative to the x stream.
    return out.reshape(n, 1)


def init_params(key):
    """torch.nn.Linear-style U(-1/sqrt(fan_in), +1/sqrt(fan_in)) init, (out, in) layout."""
    dims = [(13, 6), (6, 3), (3, 1)]
    params = {}
    keys = jax.random.split(key, 2 * len(dims))
    for idx, (fin, fout) in enumerate(dims):
        bound = float(fin) ** -0.5
        w = jax.random.uniform(keys[2 * idx], (fout, fin), jnp.float32, -bound, bound)
        b = jax.random.uniform(keys[2 * idx + 1], (fout, 1), jnp.float32, -bound, bound)
        params[f"w{idx + 1}"] = w
        params[f"b{idx + 1}"] = b
    return params


def reference_forward(x, params):
    h1 = jax.nn.sigmoid(x @ params["w1"].T + params["b1"].T)
    h2 = jax.nn.sigmoid(h1 @ params["w2"].T + params["b2"].T)
    return h2 @ params["w3"].T + params["b3"].T


if __name__ == "__main__":
    key = jax.random.PRNGKey(0)
    k_x, k_x2, k_p = jax.random.split(key, 3)

    params = init_params(k_p)

    # Tiny batch (13 input features as Linear(13, 6) implies): single partial
    # grid step where the block is larger than the array.
    N = 8
    x = jax.random.normal(k_x, (N, 13), dtype=jnp.float32)
    out = jax.block_until_ready(network_forward(x, params))
    ref = reference_forward(x, params)
    assert out.shape == (N, 1)
    assert jnp.allclose(out, ref, atol=1e-5, rtol=1e-5)

    # Larger batch with the default tile heuristic: ~8-step "parallel" grid
    # (both v7x TensorCores busy) and a ragged final tile (no jnp.pad, no x.T).
    N2 = 1000
    x2 = jax.random.normal(k_x2, (N2, 13), dtype=jnp.float32)
    out2 = jax.block_until_ready(network_forward(x2, params))
    ref2 = reference_forward(x2, params)
    assert out2.shape == (N2, 1)
    assert jnp.allclose(out2, ref2, atol=1e-5, rtol=1e-5)

    print("KERNEL_OK")
</pallas_src>

<mosaic_0001>
module attributes {stable_mosaic.version = 11 : i64} {
  func.func @mlp_kernel(%arg0: i32, %arg1: memref<128x13xf32, #tpu.memory_space<vmem>>, %arg2: memref<6x13xf32, #tpu.memory_space<vmem>>, %arg3: memref<6x1xf32, #tpu.memory_space<vmem>>, %arg4: memref<3x6xf32, #tpu.memory_space<vmem>>, %arg5: memref<3x1xf32, #tpu.memory_space<vmem>>, %arg6: memref<1x3xf32, #tpu.memory_space<vmem>>, %arg7: memref<1x1xf32, #tpu.memory_space<vmem>>, %arg8: memref<1x128xf32, #tpu.memory_space<vmem>>) attributes {dimension_semantics = [#tpu.dimension_semantics<parallel>], iteration_bounds = array<i64: 1>, scalar_prefetch = 0 : i64, scratch_operands = 0 : i64, tpu.core_type = #tpu.core_type<tc>, window_params = [{transform_indices = @transform_0, window_bounds = array<i64: 128, 13>}, {pipeline_mode = #tpu.pipeline_mode<synchronous>, transform_indices = @transform_1, window_bounds = array<i64: 6, 13>}, {pipeline_mode = #tpu.pipeline_mode<synchronous>, transform_indices = @transform_2, window_bounds = array<i64: 6, 1>}, {pipeline_mode = #tpu.pipeline_mode<synchronous>, transform_indices = @transform_3, window_bounds = array<i64: 3, 6>}, {pipeline_mode = #tpu.pipeline_mode<synchronous>, transform_indices = @transform_4, window_bounds = array<i64: 3, 1>}, {pipeline_mode = #tpu.pipeline_mode<synchronous>, transform_indices = @transform_5, window_bounds = array<i64: 1, 3>}, {pipeline_mode = #tpu.pipeline_mode<synchronous>, transform_indices = @transform_6, window_bounds = array<i64: 1, 1>}, {transform_indices = @transform_7, window_bounds = array<i64: 1, 128>}]} {
    %c0 = arith.constant 0 : index
    %c0_0 = arith.constant 0 : index
    %0 = vector.load %arg1[%c0, %c0_0] : memref<128x13xf32, #tpu.memory_space<vmem>>, vector<128x13xf32>
    %c0_1 = arith.constant 0 : index
    %c0_2 = arith.constant 0 : index
    %1 = vector.load %arg2[%c0_1, %c0_2] : memref<6x13xf32, #tpu.memory_space<vmem>>, vector<6x13xf32>
    %cst = arith.constant dense<0.000000e+00> : vector<6x128xf32>
    %2 = tpu.matmul %1, %0, %cst {dimension_numbers = #tpu.dot_dimension_numbers<[1], [1], [0], [0], [0, 0, 1, 0], [], []>} : vector<6x13xf32>, vector<128x13xf32>, vector<6x128xf32> -> vector<6x128xf32>
    %c0_3 = arith.constant 0 : index
    %c0_4 = arith.constant 0 : index
    %3 = vector.load %arg3[%c0_3, %c0_4] : memref<6x1xf32, #tpu.memory_space<vmem>>, vector<6x1xf32>
    %4 = vector.broadcast %3 : vector<6x1xf32> to vector<6x128xf32>
    %5 = arith.addf %2, %4 : vector<6x128xf32>
    %cst_5 = arith.constant 5.000000e-01 : f32
    %6 = vector.broadcast %cst_5 : f32 to vector<6x128xf32>
    %7 = arith.mulf %6, %5 : vector<6x128xf32>
    %8 = math.tanh %7 : vector<6x128xf32>
    %cst_6 = arith.constant 5.000000e-01 : f32
    %9 = vector.broadcast %cst_6 : f32 to vector<6x128xf32>
    %10 = arith.mulf %9, %8 : vector<6x128xf32>
    %cst_7 = arith.constant 5.000000e-01 : f32
    %11 = vector.broadcast %cst_7 : f32 to vector<6x128xf32>
    %12 = arith.addf %10, %11 : vector<6x128xf32>
    %c0_8 = arith.constant 0 : index
    %c0_9 = arith.constant 0 : index
    %13 = vector.load %arg4[%c0_8, %c0_9] : memref<3x6xf32, #tpu.memory_space<vmem>>, vector<3x6xf32>
    %cst_10 = arith.constant dense<0.000000e+00> : vector<3x128xf32>
    %14 = tpu.matmul %13, %12, %cst_10 {dimension_numbers = #tpu.dot_dimension_numbers<[1], [0], [0], [1], [0, 0, 1, 1], [], []>} : vector<3x6xf32>, vector<6x128xf32>, vector<3x128xf32> -> vector<3x128xf32>
    %c0_11 = arith.constant 0 : index
    %c0_12 = arith.constant 0 : index
    %15 = vector.load %arg5[%c0_11, %c0_12] : memref<3x1xf32, #tpu.memory_space<vmem>>, vector<3x1xf32>
    %16 = vector.broadcast %15 : vector<3x1xf32> to vector<3x128xf32>
    %17 = arith.addf %14, %16 : vector<3x128xf32>
    %cst_13 = arith.constant 5.000000e-01 : f32
    %18 = vector.broadcast %cst_13 : f32 to vector<3x128xf32>
    %19 = arith.mulf %18, %17 : vector<3x128xf32>
    %20 = math.tanh %19 : vector<3x128xf32>
    %cst_14 = arith.constant 5.000000e-01 : f32
    %21 = vector.broadcast %cst_14 : f32 to vector<3x128xf32>
    %22 = arith.mulf %21, %20 : vector<3x128xf32>
    %cst_15 = arith.constant 5.000000e-01 : f32
    %23 = vector.broadcast %cst_15 : f32 to vector<3x128xf32>
    %24 = arith.addf %22, %23 : vector<3x128xf32>
    %c0_16 = arith.constant 0 : index
    %c0_17 = arith.constant 0 : index
    %25 = vector.load %arg6[%c0_16, %c0_17] : memref<1x3xf32, #tpu.memory_space<vmem>>, vector<1x3xf32>
    %cst_18 = arith.constant dense<0.000000e+00> : vector<1x128xf32>
    %26 = tpu.matmul %25, %24, %cst_18 {dimension_numbers = #tpu.dot_dimension_numbers<[1], [0], [0], [1], [0, 0, 1, 1], [], []>} : vector<1x3xf32>, vector<3x128xf32>, vector<1x128xf32> -> vector<1x128xf32>
    %c0_19 = arith.constant 0 : index
    %c0_20 = arith.constant 0 : index
    %27 = vector.load %arg7[%c0_19, %c0_20] : memref<1x1xf32, #tpu.memory_space<vmem>>, vector<1x1xf32>
    %28 = vector.broadcast %27 : vector<1x1xf32> to vector<1x128xf32>
    %29 = arith.addf %26, %28 : vector<1x128xf32>
    %c0_21 = arith.constant 0 : index
    %c0_22 = arith.constant 0 : index
    %30 = vector.load %arg8[%c0_21, %c0_22] : memref<1x128xf32, #tpu.memory_space<vmem>>, vector<1x128xf32>
    tpu.vector_store %arg8[%c0_21, %c0_22], %29 {strides = array<i32>} : memref<1x128xf32, #tpu.memory_space<vmem>>, vector<1x128xf32>,
    return
  }
  func.func @transform_0(%arg0: i32) -> (i32, i32) {
    %c0_i32 = arith.constant 0 : i32
    %c0_i32_0 = arith.constant 0 : i32
    return %arg0, %c0_i32 : i32, i32
  }
  func.func @transform_1(%arg0: i32) -> (i32, i32) {
    %c0_i32 = arith.constant 0 : i32
    %c0_i32_0 = arith.constant 0 : i32
    %c0_i32_1 = arith.constant 0 : i32
    return %c0_i32, %c0_i32_0 : i32, i32
  }
  func.func @transform_2(%arg0: i32) -> (i32, i32) {
    %c0_i32 = arith.constant 0 : i32
    %c0_i32_0 = arith.constant 0 : i32
    %c0_i32_1 = arith.constant 0 : i32
    return %c0_i32, %c0_i32_0 : i32, i32
  }
  func.func @transform_3(%arg0: i32) -> (i32, i32) {
    %c0_i32 = arith.constant 0 : i32
    %c0_i32_0 = arith.constant 0 : i32
    %c0_i32_1 = arith.constant 0 : i32
    return %c0_i32, %c0_i32_0 : i32, i32
  }
  func.func @transform_4(%arg0: i32) -> (i32, i32) {
    %c0_i32 = arith.constant 0 : i32
    %c0_i32_0 = arith.constant 0 : i32
    %c0_i32_1 = arith.constant 0 : i32
    return %c0_i32, %c0_i32_0 : i32, i32
  }
  func.func @transform_5(%arg0: i32) -> (i32, i32) {
    %c0_i32 = arith.constant 0 : i32
    %c0_i32_0 = arith.constant 0 : i32
    %c0_i32_1 = arith.constant 0 : i32
    return %c0_i32, %c0_i32_0 : i32, i32
  }
  func.func @transform_6(%arg0: i32) -> (i32, i32) {
    %c0_i32 = arith.constant 0 : i32
    %c0_i32_0 = arith.constant 0 : i32
    %c0_i32_1 = arith.constant 0 : i32
    return %c0_i32, %c0_i32_0 : i32, i32
  }
  func.func @transform_7(%arg0: i32) -> (i32, i32) {
    %c0_i32 = arith.constant 0 : i32
    %c0_i32_0 = arith.constant 0 : i32
    return %c0_i32, %arg0 : i32, i32
  }
}

</mosaic_0001>

<bundles_post_ra>
// kernel: tpu_custom_call.1
= control target key start
LH: loop header
LB: loop body
LE: loop exit
PB: predicated region body
PF: predicated region fallthrough
CT: control target
= control target key end

     0   :  { %s446_s0 = inlined_call_operand.vmem [shape: f32[8,13], index: 0, kind: input, shape index: {}]   ;;  %s447_s1 = inlined_call_operand.hbm [shape: f32[6,13], index: 1, kind: input, shape index: {}]   ;;  %s448_s2 = inlined_call_operand.vmem [shape: f32[6,1], index: 2, kind: input, shape index: {}]   ;;  %s449_s3 = inlined_call_operand.vmem [shape: f32[3,6], index: 3, kind: input, shape index: {}]   ;;  %s450_s4 = inlined_call_operand.vmem [shape: f32[3,1], index: 4, kind: input, shape index: {}]   ;;  %s451_s5 = inlined_call_operand.vmem [shape: f32[1,3], index: 5, kind: input, shape index: {}]   ;;  %s452_s6 = inlined_call_operand.<no memory space> [shape: f32[1,1], index: 6, kind: input, shape index: {}]   ;;  %s453_s7 = inlined_call_operand.hbm [shape: f32[1,8], index: 7, kind: output, shape index: {}]  }
   0x1   :  { %v12_v0 = vstv %s452_s6 }
   0x2   :  { %13 = vst [vmem:[#allocation2] sm:$0x1] %v12_v0 }
   0x3   :  { %14 = vsyncpa [#allocation4], 0 }
   0x4   :  { %15 = vsyncpa [#allocation5], 0  ;;  %s23_s28 = sshll.u32 %s447_s1, 4  ;;  %s317_s29 = smov [#allocation3]   ;;  %s24_s28 = int_to_ptr.hbm [resolvable:$true] %s23_s28 }
   0x5   :  { %s25_s30 = sshll.u32 %s317_s29, 4  ;;  %s26_s30 = int_to_ptr.vmem [resolvable:$true] %s25_s30 }
   0x6   :  { %28 = dma.hbm_to_vmem [thread:$0]  %s24_s28, 128, %s26_s30, [#allocation4]  }
   0x7   :  { %313 = dma.done.wait [#allocation4], 128  }
   0x8   :  { %314 = vsyncadd [#allocation4], 4294967168  ;;  %vm66_vm0 = vcmask 105472   ;;  %v58_v1 = vld [vmem:[%s446_s0 + $0x78] sm:$0xff]  ;;  %v57_v2 = vld [vmem:[%s446_s0 + $0x70] sm:$0xff]  ;;  %v318_v11 = vmov 0  }
   0x9   :  { %235 = vmatpush.xpose.msk.msra.mxu0 %vm66_vm0, %v58_v1  ;;  %v56_v3 = vld [vmem:[%s446_s0 + $0x68] sm:$0xff]  ;;  %v55_v4 = vld [vmem:[%s446_s0 + $0x60] sm:$0xff]  ;;  %v54_v5 = vld [vmem:[%s446_s0 + $0x58] sm:$0xff]  ;;  %259 = vset.pattern.permute.xlu0 %v318_v11  ;;  %vm153_vm1 = vcmask 1045504   ;;  %vm149_vm2 = vcmask 48128   ;;  %vm193_vm3 = vcmask 1042432  }
   0xa   :  { %v53_v6 = vld [vmem:[%s446_s0 + $0x50] sm:$0xff]  ;;  %v52_v7 = vld [vmem:[%s446_s0 + $0x48] sm:$0xff]  ;;  %v51_v8 = vld [vmem:[%s446_s0 + $0x40] sm:$0xff]  ;;  %260 = vset.pattern.permute.xlu1 %v318_v11  ;;  %vm189_vm4 = vcmask 23552   ;;  %s225_s21 = sshll.u32 %s453_s7, 4  ;;  %s226_s21 = int_to_ptr.hbm [resolvable:$true] %s225_s21 }
   0xb   :  { %v50_v9 = vld [vmem:[%s446_s0 + $0x38] sm:$0xff]  ;;  %v60_v10 = vld [vmem:[%s448_s2] sm:$0x3f]  ;;  %v49_v12 = vld [vmem:[%s446_s0 + $0x30] sm:$0xff] }
   0xc   :  { %63 = vperm.xlu0 %259, %v60_v10   ;;  %v48_v13 = vld [vmem:[%s446_s0 + $0x28] sm:$0xff]  ;;  %v143_v14 = vld [vmem:[%s450_s4] sm:$0x7]  ;;  %v46_v16 = vld [vmem:[%s446_s0 + $0x18] sm:$0xff] }
   0xd   :  { %236 = vmatpush.xpose.msk.msra.mxu0 %vm66_vm0, %v57_v2  ;;  %v47_v15 = vld [vmem:[%s446_s0 + $0x20] sm:$0xff]  ;;  %v45_v17 = vld [vmem:[%s446_s0 + $0x10] sm:$0xff]  ;;  %v44_v18 = vld [vmem:[%s446_s0 + $0x8] sm:$0xff] }
   0xe   :  { %v43_v19 = vld [vmem:[%s446_s0] sm:$0xff] }
   0xf   :  { %v59_v20 = vld [vmem:[#allocation3] sm:$0x3f]  ;;  %v182_v29 = vld [vmem:[#allocation2] sm:$0x1] }
  0x10   :  { %v142_v28 = vld [vmem:[%s449_s3] sm:$0x7]  ;;  %185 = vperm.xlu1 %260, %v182_v29   ;;  %s319_s3 = smov [#allocation6]  }
  0x11   :  { %237 = vmatpush.xpose.msk.msra.mxu0 %vm66_vm0, %v56_v3  ;;  %v181_v37 = vld [vmem:[%s451_s5] sm:$0x1]  ;;  %s223_s18 = sshll.u32 %s319_s3, 4  ;;  %s224_s18 = int_to_ptr.vmem [resolvable:$true] %s223_s18 }
  0x14   :  { %146 = vperm.xlu0 %259, %v143_v14  }
  0x15   :  { %238 = vmatpush.xpose.msk.msra.mxu0 %vm66_vm0, %v55_v4 }
  0x19   :  { %239 = vmatpush.xpose.msk.msra.mxu0 %vm66_vm0, %v54_v5 }
  0x1d   :  { %240 = vmatpush.xpose.msk.msra.mxu0 %vm66_vm0, %v53_v6 }
  0x21   :  { %241 = vmatpush.xpose.msk.msra.mxu0 %vm66_vm0, %v52_v7 }
  0x25   :  { %242 = vmatpush.xpose.msk.msra.mxu0 %vm66_vm0, %v51_v8 }
  0x29   :  { %243 = vmatpush.xpose.msk.msra.mxu0 %vm66_vm0, %v50_v9 }
  0x2d   :  { %244 = vmatpush.xpose.msk.msra.mxu0 %vm66_vm0, %v49_v12 }
  0x31   :  { %245 = vmatpush.xpose.msk.msra.mxu0 %vm66_vm0, %v48_v13 }
  0x35   :  { %246 = vmatpush.xpose.msk.msra.mxu0 %vm66_vm0, %v47_v15 }
  0x39   :  { %247 = vmatpush.xpose.msk.msra.mxu0 %vm66_vm0, %v46_v16 }
  0x3d   :  { %248 = vmatpush.xpose.msk.msra.mxu0 %vm66_vm0, %v45_v17 }
  0x41   :  { %249 = vmatpush.xpose.msk.msra.mxu0 %vm66_vm0, %v44_v18 }
  0x45   :  { %250 = vmatpush.xpose.msk.msra.mxu0 %vm66_vm0, %v43_v19 }
  0x48   :  { %251 = vmatmul.msk.f32.vlgmr.msra.gmra.mxu0 %vm66_vm0, %v59_v20 }
  0x7e   :  { %v64_v21 = vpop.permute.xlu0 %63 }
  0x82   :  { %v186_v38 = vpop.permute.xlu1 %185 }
  0x83   :  { %v188_v39 = vperm.slane %v186_v38, 0 }
  0x86   :  { %v147_v30 = vpop.permute.xlu0 %146 }
  0xc5   :  { %v135_v22 = vpop.f32.mrf.mxu0 }
  0xc6   :  { %v136_v23 = vadd.f32 %v135_v22, %v64_v21 }
  0xc8   :  { %v138_v24 = vmul.f32 0.5, %v136_v23 }
  0xca   :  { %261 = vtanh.f32 %v138_v24 }
  0xd0   :  { %v262_v25 = vpop.eup %261 }
  0xd1   :  { %v140_v26 = vmul.f32 0.5, %v262_v25 }
  0xd3   :  { %v141_v27 = vadd.f32 0.5, %v140_v26 }
  0xd5   :  { %252 = vmatpush.msk.msra.mxu1 %vm153_vm1, %v141_v27 }
  0xd6   :  { %253 = vmatmul.msk.f32.vlgmr.msra.gmra.mxu1 %vm149_vm2, %v142_v28 }
 0x153   :  { %v174_v31 = vpop.f32.mrf.mxu1 }
 0x154   :  { %v175_v32 = vadd.f32 %v174_v31, %v147_v30 }
 0x156   :  { %v177_v33 = vmul.f32 0.5, %v175_v32 }
 0x158   :  { %263 = vtanh.f32 %v177_v33 }
 0x15e   :  { %v264_v34 = vpop.eup %263 }
 0x15f   :  { %v179_v35 = vmul.f32 0.5, %v264_v34 }
 0x161   :  { %v180_v36 = vadd.f32 0.5, %v179_v35 }
 0x163   :  { %254 = vmatpush.msk.msra.mxu2 %vm193_vm3, %v180_v36 }
 0x164   :  { %255 = vmatmul.msk.f32.vlgmr.msra.gmra.mxu2 %vm189_vm4, %v181_v37 }
 0x1e7   :  { %v214_v40 = vpop.f32.mrf.mxu2 }
 0x1e8   :  { %v215_v41 = vadd.f32 %v214_v40, %v188_v39 }
 0x1ea   :  { %217 = vst [vmem:[#allocation6] sm:$0x1] %v215_v41 }
 0x1eb   :  { %228 = dma.vmem_to_hbm [thread:$0]  %s224_s18, 16, %s226_s21, [#allocation5]  }
 0x1ec   :  { %315 = dma.done.wait [#allocation5], 16  }
 0x1ed   :  { %316 = vsyncadd [#allocation5], 4294967280 }
 0x1ee   :  { %233 = vsyncpa [#allocation4], 1 }
 0x1ef   :  { %234 = vsyncpa [#allocation5], 1 }

</bundles_post_ra>
